<compile_context>
chip_gen: v5e
topology: v5e:2x2
jax: 0.10.0
libtpu: 0.0.40
codegen_flags: <defaults>
</compile_context>

<pallas_src>
import functools

import jax
import jax.numpy as jnp
from jax.experimental import pallas as pl
from jax.experimental.pallas import tpu as pltpu


def _round_up(x, m):
    return (x + m - 1) // m * m


_ACT_DTYPE = jnp.bfloat16            # streamed dtype for zr/zc and W1 (accumulation stays f32)
_ACT_BYTES = 2
_VMEM_BUDGET = 40 * 1024 * 1024      # conservative: leaves headroom inside v7x's 64 MiB physical VMEM


def _vmem_bytes(H, tile_e):
    act = 2 * 2 * H * tile_e * _ACT_BYTES            # zr/zc tiles, double-buffered
    out = 2 * tile_e * 4                             # output tile, double-buffered
    h1 = H * tile_e * 4                              # f32 intermediate
    wts = 2 * H * H * _ACT_BYTES + 4 * (2 * H + 1)   # single-buffered weights + biases
    return act + out + h1 + wts


def edge_decoder_kernel(zr_ref, zc_ref, w1a_ref, w1b_ref, b1_ref, w2_ref, b2_ref, o_ref):
    # zr_ref / zc_ref: (H, TILE_E) bf16 — edges on the lane axis so every VPU op and the final
    # store are lane-dense (TILE_E is a multiple of 128).
    h1 = (jnp.dot(w1a_ref[...], zr_ref[...], preferred_element_type=jnp.float32)
          + jnp.dot(w1b_ref[...], zc_ref[...], preferred_element_type=jnp.float32)
          + b1_ref[...])                                    # (H, TILE_E) f32; bias broadcast over lanes
    h1 = jnp.maximum(h1, 0.0)                               # relu on the f32 accumulator
    # lin2: an M=1 MXU matmul wastes the systolic array -> VPU multiply + sublane (XLU) reduce.
    out = jnp.sum(h1 * w2_ref[...], axis=0, keepdims=True) + b2_ref[...]   # (1, TILE_E)
    o_ref[...] = out.astype(o_ref.dtype)


def _const_spec(shape):
    # Resident across grid steps; single-buffered — a constant-index block is never re-fetched,
    # so the default second buffer is pure VMEM waste.
    n = len(shape)
    return pl.BlockSpec(shape, lambda i: (0,) * n, pipeline_mode=pl.Buffered(1))


@functools.partial(jax.jit, static_argnames=("tile_e",))
def edge_decoder(z_author, edge_label_index, params, *, tile_e=4096):
    """z_author: (N, H) f32; edge_label_index: (2, E) int32;
    params = (w1 (H, 2H), b1 (H,), w2 (1, H), b2 (1,)).  tile_e is the per-chip tuning knob
    (v6e can push 8192+; the defaults below are sized to be safe on v5e/v6e/v7x)."""
    w1, b1, w2, b2 = params
    H = w1.shape[0]
    row, col = edge_label_index[0], edge_label_index[1]
    E = row.shape[0]

    assert tile_e > 0 and tile_e % 128 == 0, "tile_e must be a positive multiple of 128"

    # --- tile-size selection (all static Python ints) -------------------------------------------
    e_min = _round_up(max(E, 1), 128)
    tile = min(tile_e, e_min)                       # clamp: don't DMA/matmul a mostly-padded tile
    if tile == e_min and e_min > 128:
        tile = _round_up(e_min // 2, 128)           # keep >= 2 grid steps -> both v7x TCs get work
    while _vmem_bytes(H, tile) > _VMEM_BUDGET and tile > 128:
        tile = max(128, _round_up(tile // 2, 128))  # stay inside v7x's smaller VMEM
    n_tiles = pl.cdiv(E, tile)
    e_pad = n_tiles * tile
    vmem_limit = int(min(48 * 1024 * 1024,
                         max(32 * 1024 * 1024, int(_vmem_bytes(H, tile) * 1.3))))

    # --- gather directly in the transposed layout (no (H, E_pad) transpose round-trip) ----------
    # TODO(synk): the data-dependent row gather has no clean BlockSpec equivalent at one-edge-per-row
    # granularity, so it stays in the wrapper (XLA gather); only the small (N, H) transpose is paid.
    row_p = jnp.pad(row, (0, e_pad - E))
    col_p = jnp.pad(col, (0, e_pad - E))
    z_t = jnp.transpose(z_author).astype(_ACT_DTYPE)          # (H, N), cast once -> bf16 gathers
    zr_t = jnp.take(z_t, row_p, axis=1)                       # (H, E_pad)
    zc_t = jnp.take(z_t, col_p, axis=1)                       # (H, E_pad)

    w1a = w1[:, :H].astype(_ACT_DTYPE)                        # acts on z[row]
    w1b = w1[:, H:].astype(_ACT_DTYPE)                        # acts on z[col]
    b1c = b1.reshape(H, 1).astype(jnp.float32)
    w2c = w2.reshape(H, 1).astype(jnp.float32)                # used on the VPU against f32 h1
    b2c = b2.reshape(1, 1).astype(jnp.float32)

    edge_spec = pl.BlockSpec((H, tile), lambda i: (0, i))

    out = pl.pallas_call(
        edge_decoder_kernel,
        out_shape=jax.ShapeDtypeStruct((1, e_pad), jnp.float32),
        grid=(n_tiles,),
        in_specs=[
            edge_spec,                 # zr^T tile (bf16)
            edge_spec,                 # zc^T tile (bf16)
            _const_spec((H, H)),       # W1[:, :H] (bf16)
            _const_spec((H, H)),       # W1[:, H:] (bf16)
            _const_spec((H, 1)),       # b1 (f32)
            _const_spec((H, 1)),       # w2 as a column (f32)
            _const_spec((1, 1)),       # b2 (f32)
        ],
        out_specs=pl.BlockSpec((1, tile), lambda i: (0, i)),
        compiler_params=pltpu.CompilerParams(
            dimension_semantics=("parallel",),      # edge tiles independent -> megacore on v7x
            vmem_limit_bytes=vmem_limit,
        ),
        cost_estimate=pl.CostEstimate(
            flops=4 * e_pad * H * H + 2 * e_pad * H,
            transcendentals=0,
            bytes_accessed=(2 * e_pad * H * _ACT_BYTES + 4 * e_pad
                            + 2 * H * H * _ACT_BYTES + 4 * (2 * H + 1)),
        ),
    )(zr_t, zc_t, w1a, w1b, b1c, w2c, b2c)

    return out.reshape(-1)[:E]


def init_params(key, hidden_channels):
    """torch.nn.Linear-style init; weights kept in torch layout (out_features, in_features)."""
    H = hidden_channels
    k1, k2, k3, k4 = jax.random.split(key, 4)
    s1 = 1.0 / jnp.sqrt(2.0 * H)
    s2 = 1.0 / jnp.sqrt(1.0 * H)
    w1 = jax.random.uniform(k1, (H, 2 * H), jnp.float32, -s1, s1)
    b1 = jax.random.uniform(k2, (H,), jnp.float32, -s1, s1)
    w2 = jax.random.uniform(k3, (1, H), jnp.float32, -s2, s2)
    b2 = jax.random.uniform(k4, (1,), jnp.float32, -s2, s2)
    return (w1, b1, w2, b2)


def _reference(z_author, edge_label_index, params):
    """Pure-JAX f32 reference mirroring the PyTorch forward."""
    w1, b1, w2, b2 = params
    row, col = edge_label_index[0], edge_label_index[1]
    z = jnp.concatenate([z_author[row], z_author[col]], axis=-1)
    return (jnp.maximum(z @ w1.T + b1, 0.0) @ w2.T + b2).reshape(-1)


if __name__ == "__main__":
    key = jax.random.PRNGKey(0)
    kz, kp, ke1, ke2 = jax.random.split(key, 4)

    N, H = 16, 32
    z_author = jax.random.normal(kz, (N, H), jnp.float32)
    params = init_params(kp, H)

    # Two edge counts: E=48 exercises the single-tile (clamped) path, E=300 exercises the
    # multi-tile path (tile split for >=2 grid steps) and the padded-tail slice.
    for E, kk in ((48, ke1), (300, ke2)):
        edge_label_index = jax.random.randint(kk, (2, E), 0, N, dtype=jnp.int32)
        out = edge_decoder(z_author, edge_label_index, params)
        jax.block_until_ready(out)
        assert out.shape == (E,)
        ref = _reference(z_author, edge_label_index, params)
        err = float(jnp.max(jnp.abs(out - ref)))
        # bf16 activation/weight streaming -> looser tolerance vs the f32 reference.
        assert jnp.allclose(out, ref, rtol=3e-2, atol=3e-2), f"E={E}: max abs err = {err}"

    print("KERNEL_OK")
</pallas_src>

<mosaic_0001>
module attributes {stable_mosaic.version = 11 : i64} {
  func.func @edge_decoder_kernel(%arg0: i32, %arg1: memref<32x128xbf16, #tpu.memory_space<vmem>>, %arg2: memref<32x128xbf16, #tpu.memory_space<vmem>>, %arg3: memref<32x32xbf16, #tpu.memory_space<vmem>>, %arg4: memref<32x32xbf16, #tpu.memory_space<vmem>>, %arg5: memref<32x1xf32, #tpu.memory_space<vmem>>, %arg6: memref<32x1xf32, #tpu.memory_space<vmem>>, %arg7: memref<1x1xf32, #tpu.memory_space<vmem>>, %arg8: memref<1x128xf32, #tpu.memory_space<vmem>>) attributes {dimension_semantics = [#tpu.dimension_semantics<parallel>], iteration_bounds = array<i64: 1>, scalar_prefetch = 0 : i64, scratch_operands = 0 : i64, tpu.core_type = #tpu.core_type<tc>, window_params = [{transform_indices = @transform_0, window_bounds = array<i64: 32, 128>}, {transform_indices = @transform_1, window_bounds = array<i64: 32, 128>}, {pipeline_mode = #tpu.pipeline_mode<synchronous>, transform_indices = @transform_2, window_bounds = array<i64: 32, 32>}, {pipeline_mode = #tpu.pipeline_mode<synchronous>, transform_indices = @transform_3, window_bounds = array<i64: 32, 32>}, {pipeline_mode = #tpu.pipeline_mode<synchronous>, transform_indices = @transform_4, window_bounds = array<i64: 32, 1>}, {pipeline_mode = #tpu.pipeline_mode<synchronous>, transform_indices = @transform_5, window_bounds = array<i64: 32, 1>}, {pipeline_mode = #tpu.pipeline_mode<synchronous>, transform_indices = @transform_6, window_bounds = array<i64: 1, 1>}, {transform_indices = @transform_7, window_bounds = array<i64: 1, 128>}]} {
    %c0 = arith.constant 0 : index
    %c0_0 = arith.constant 0 : index
    %0 = vector.load %arg3[%c0, %c0_0] : memref<32x32xbf16, #tpu.memory_space<vmem>>, vector<32x32xbf16>
    %c0_1 = arith.constant 0 : index
    %c0_2 = arith.constant 0 : index
    %1 = vector.load %arg1[%c0_1, %c0_2] : memref<32x128xbf16, #tpu.memory_space<vmem>>, vector<32x128xbf16>
    %cst = arith.constant dense<0.000000e+00> : vector<32x128xf32>
    %2 = tpu.matmul %0, %1, %cst {dimension_numbers = #tpu.dot_dimension_numbers<[1], [0], [0], [1], [0, 0, 1, 1], [], []>} : vector<32x32xbf16>, vector<32x128xbf16>, vector<32x128xf32> -> vector<32x128xf32>
    %c0_3 = arith.constant 0 : index
    %c0_4 = arith.constant 0 : index
    %3 = vector.load %arg4[%c0_3, %c0_4] : memref<32x32xbf16, #tpu.memory_space<vmem>>, vector<32x32xbf16>
    %c0_5 = arith.constant 0 : index
    %c0_6 = arith.constant 0 : index
    %4 = vector.load %arg2[%c0_5, %c0_6] : memref<32x128xbf16, #tpu.memory_space<vmem>>, vector<32x128xbf16>
    %cst_7 = arith.constant dense<0.000000e+00> : vector<32x128xf32>
    %5 = tpu.matmul %3, %4, %cst_7 {dimension_numbers = #tpu.dot_dimension_numbers<[1], [0], [0], [1], [0, 0, 1, 1], [], []>} : vector<32x32xbf16>, vector<32x128xbf16>, vector<32x128xf32> -> vector<32x128xf32>
    %6 = arith.addf %2, %5 : vector<32x128xf32>
    %c0_8 = arith.constant 0 : index
    %c0_9 = arith.constant 0 : index
    %7 = vector.load %arg5[%c0_8, %c0_9] : memref<32x1xf32, #tpu.memory_space<vmem>>, vector<32x1xf32>
    %8 = vector.broadcast %7 : vector<32x1xf32> to vector<32x128xf32>
    %9 = arith.addf %6, %8 : vector<32x128xf32>
    %cst_10 = arith.constant 0.000000e+00 : f32
    %10 = vector.broadcast %cst_10 : f32 to vector<32x128xf32>
    %11 = arith.maximumf %9, %10 : vector<32x128xf32>
    %c0_11 = arith.constant 0 : index
    %c0_12 = arith.constant 0 : index
    %12 = vector.load %arg6[%c0_11, %c0_12] : memref<32x1xf32, #tpu.memory_space<vmem>>, vector<32x1xf32>
    %13 = vector.broadcast %12 : vector<32x1xf32> to vector<32x128xf32>
    %14 = arith.mulf %11, %13 : vector<32x128xf32>
    %cst_13 = arith.constant dense<0.000000e+00> : vector<128xf32>
    %15 = vector.multi_reduction <add>, %14, %cst_13 [0] : vector<32x128xf32> to vector<128xf32>
    %16 = vector.shape_cast %15 : vector<128xf32> to vector<1x128xf32>
    %c0_14 = arith.constant 0 : index
    %c0_15 = arith.constant 0 : index
    %17 = vector.load %arg7[%c0_14, %c0_15] : memref<1x1xf32, #tpu.memory_space<vmem>>, vector<1x1xf32>
    %18 = vector.broadcast %17 : vector<1x1xf32> to vector<1x128xf32>
    %19 = arith.addf %16, %18 : vector<1x128xf32>
    %c0_16 = arith.constant 0 : index
    %c0_17 = arith.constant 0 : index
    %20 = vector.load %arg8[%c0_16, %c0_17] : memref<1x128xf32, #tpu.memory_space<vmem>>, vector<1x128xf32>
    tpu.vector_store %arg8[%c0_16, %c0_17], %19 {strides = array<i32>} : memref<1x128xf32, #tpu.memory_space<vmem>>, vector<1x128xf32>,
    return
  }
  func.func @transform_0(%arg0: i32) -> (i32, i32) {
    %c0_i32 = arith.constant 0 : i32
    %c0_i32_0 = arith.constant 0 : i32
    return %c0_i32, %arg0 : i32, i32
  }
  func.func @transform_1(%arg0: i32) -> (i32, i32) {
    %c0_i32 = arith.constant 0 : i32
    %c0_i32_0 = arith.constant 0 : i32
    return %c0_i32, %arg0 : i32, i32
  }
  func.func @transform_2(%arg0: i32) -> (i32, i32) {
    %c0_i32 = arith.constant 0 : i32
    %c0_i32_0 = arith.constant 0 : i32
    %c0_i32_1 = arith.constant 0 : i32
    return %c0_i32, %c0_i32_0 : i32, i32
  }
  func.func @transform_3(%arg0: i32) -> (i32, i32) {
    %c0_i32 = arith.constant 0 : i32
    %c0_i32_0 = arith.constant 0 : i32
    %c0_i32_1 = arith.constant 0 : i32
    return %c0_i32, %c0_i32_0 : i32, i32
  }
  func.func @transform_4(%arg0: i32) -> (i32, i32) {
    %c0_i32 = arith.constant 0 : i32
    %c0_i32_0 = arith.constant 0 : i32
    %c0_i32_1 = arith.constant 0 : i32
    return %c0_i32, %c0_i32_0 : i32, i32
  }
  func.func @transform_5(%arg0: i32) -> (i32, i32) {
    %c0_i32 = arith.constant 0 : i32
    %c0_i32_0 = arith.constant 0 : i32
    %c0_i32_1 = arith.constant 0 : i32
    return %c0_i32, %c0_i32_0 : i32, i32
  }
  func.func @transform_6(%arg0: i32) -> (i32, i32) {
    %c0_i32 = arith.constant 0 : i32
    %c0_i32_0 = arith.constant 0 : i32
    %c0_i32_1 = arith.constant 0 : i32
    return %c0_i32, %c0_i32_0 : i32, i32
  }
  func.func @transform_7(%arg0: i32) -> (i32, i32) {
    %c0_i32 = arith.constant 0 : i32
    %c0_i32_0 = arith.constant 0 : i32
    return %c0_i32, %arg0 : i32, i32
  }
}

</mosaic_0001>

<bundles_post_ra>
// kernel: edge_decoder.1
= control target key start
LH: loop header
LB: loop body
LE: loop exit
PB: predicated region body
PF: predicated region fallthrough
CT: control target
= control target key end

     0   :  { %v274_v2 = vmov 0   ;;  %vm67_vm0 = vcmask 261120   ;;  %s369_s1 = inlined_call_operand.vmem [shape: bf16[32,128], index: 1, kind: input, shape index: {}]   ;;  %s370_s0 = inlined_call_operand.vmem [shape: bf16[32,128], index: 0, kind: input, shape index: {}]   ;;  %s371_s4 = inlined_call_operand.vmem [shape: f32[32,1], index: 4, kind: input, shape index: {}]   ;;  %s372_s6 = inlined_call_operand.<no memory space> [shape: f32[1,1], index: 6, kind: input, shape index: {}]   ;;  %s373_s3 = inlined_call_operand.vmem [shape: bf16[32,32], index: 3, kind: input, shape index: {}]   ;;  %s374_s2 = inlined_call_operand.vmem [shape: bf16[32,32], index: 2, kind: input, shape index: {}]   ;;  %s375_s5 = inlined_call_operand.vmem [shape: f32[32,1], index: 5, kind: input, shape index: {}]   ;;  %s376_s7 = inlined_call_operand.vmem [shape: f32[1,128], index: 7, kind: output, shape index: {}]  }
   0x1   :  { %v265_v0 = vld [vmem:[%s369_s1 + $0x8] sm:$0xff]  ;;  %271 = vset.pattern.permute.xlu0 %v274_v2  ;;  %v140_v3 = vld [vmem:[%s371_s4] sm:$0xff]  ;;  %272 = vset.pattern.permute.xlu1 %v274_v2  ;;  %v12_v4 = vstv %s372_s6  ;;  %v142_v5 = vld [vmem:[%s371_s4 + $0x10] sm:$0xff] }
   0x2   :  { %v261_v1 = vld [vmem:[%s370_s0 + $0x8] sm:$0xff]  ;;  %146 = vperm.xlu0 %271, %v140_v3   ;;  %273 = vset.pattern.permute.xlu2 %v274_v2  ;;  %13 = vst [vmem:[#allocation2] sm:$0x1] %v12_v4  ;;  %v264_v6 = vld [vmem:[%s369_s1] sm:$0xff]  ;;  %v143_v14 = vld [vmem:[%s371_s4 + $0x18] sm:$0xff] }
   0x3   :  { %80 = vmatpush.bf16.msra.mxu0 %v265_v0  ;;  %266 = vmatpush.bf16.msra.mxu2 %v265_v0  ;;  %v260_v7 = vld [vmem:[%s370_s0] sm:$0xff]  ;;  %v263_v10 = vld [vmem:[%s373_s3 + $0x8] sm:$0xff]  ;;  %v174_v16 = vld [vmem:[%s375_s5 + $0x10] sm:$0xff] }
   0x4   :  { %127 = vmatpush.bf16.msra.mxu1 %v261_v1  ;;  %268 = vmatpush.bf16.msra.mxu3 %v261_v1  ;;  %v172_v8 = vld [vmem:[%s375_s5] sm:$0xff]  ;;  %v259_v12 = vld [vmem:[%s374_s2 + $0x8] sm:$0xff]  ;;  %v175_v17 = vld [vmem:[%s375_s5 + $0x18] sm:$0xff] }
   0x5   :  { %156 = vperm.xlu1 %272, %v142_v5   ;;  %v262_v9 = vld [vmem:[%s373_s3] sm:$0xff]  ;;  %178 = vperm.xlu2 %273, %v172_v8   ;;  %v141_v13 = vld [vmem:[%s371_s4 + $0x8] sm:$0xff] }
   0x6   :  { %v258_v11 = vld [vmem:[%s374_s2] sm:$0xff]  ;;  %v173_v15 = vld [vmem:[%s375_s5 + $0x8] sm:$0xff] }
   0x7   :  { %81 = vmatpush.bf16.msra.mxu0 %v264_v6  ;;  %267 = vmatpush.bf16.msra.mxu2 %v264_v6 }
   0x8   :  { %128 = vmatpush.bf16.msra.mxu1 %v260_v7  ;;  %269 = vmatpush.bf16.msra.mxu3 %v260_v7 }
   0x9   :  { %v209_v18 = vld [vmem:[#allocation2] sm:$0x1] }
   0xa   :  { %238 = vmatmul.msk.bf16.vlgmr.msra.gmra.mxu0 %vm67_vm0, %v262_v9  ;;  %239 = vmatmul.msk.bf16.vlgmr.msra.gmra.mxu2 %vm67_vm0, %v263_v10 }
   0xb   :  { %256 = vmatmul.msk.bf16.vlgmr.msra.gmra.mxu1 %vm67_vm0, %v258_v11  ;;  %257 = vmatmul.msk.bf16.vlgmr.msra.gmra.mxu3 %vm67_vm0, %v259_v12 }
   0xc   :  { %151 = vperm.xlu0 %271, %v141_v13  }
   0xd   :  { %161 = vperm.xlu1 %272, %v143_v14   ;;  %183 = vperm.xlu2 %273, %v173_v15  }
  0x14   :  { %188 = vperm.xlu0 %271, %v174_v16  }
  0x15   :  { %193 = vperm.xlu1 %272, %v175_v17   ;;  %212 = vperm.xlu2 %273, %v209_v18  }
  0x5f   :  { %v179_v24 = vpop.permute.xlu2 %178 }
  0x67   :  { %v184_v39 = vpop.permute.xlu2 %183 }
  0x6f   :  { %v213_v58 = vpop.permute.xlu2 %212 }
  0x70   :  { %v215_v60 = vperm.slane %v213_v58, 0 }
  0x74   :  { %v147_v19 = vpop.permute.xlu0 %146 }
  0x77   :  { %v157_v21 = vpop.permute.xlu1 %156 }
  0x7e   :  { %v152_v30 = vpop.permute.xlu0 %151 }
  0x7f   :  { %v162_v33 = vpop.permute.xlu1 %161 }
  0x86   :  { %v189_v47 = vpop.permute.xlu0 %188 }
  0x87   :  { %v83_v20 = vpop.f32.mrf.mxu0  ;;  %v194_v50 = vpop.permute.xlu1 %193 }
  0x88   :  { %v130_v22 = vpop.f32.mrf.mxu1 }
  0x89   :  { %v131_v23 = vadd.f32 %v130_v22, %v83_v20 }
  0x8b   :  { %v164_v27 = vadd.f32 %v147_v19, %v131_v23 }
  0x8d   :  { %v88_v25 = vpop.f32.mrf.mxu2  ;;  %v168_v34 = vmax.f32 %v164_v27, 0.0 }
  0x8e   :  { %v135_v26 = vpop.f32.mrf.mxu3 }
  0x8f   :  { %v136_v28 = vadd.f32 %v135_v26, %v88_v25  ;;  %v85_v29 = vpop.f32.mrf.mxu0  ;;  %v196_v41 = vmul.f32 %v179_v24, %v168_v34 }
  0x90   :  { %v132_v31 = vpop.f32.mrf.mxu1 }
  0x91   :  { %v133_v32 = vadd.f32 %v132_v31, %v85_v29  ;;  %v166_v35 = vadd.f32 %v157_v21, %v136_v28 }
  0x93   :  { %v165_v36 = vadd.f32 %v152_v30, %v133_v32  ;;  %v170_v42 = vmax.f32 %v166_v35, 0.0 }
  0x95   :  { %v169_v37 = vmax.f32 %v165_v36, 0.0  ;;  %v90_v38 = vpop.f32.mrf.mxu2  ;;  %v198_v48 = vmul.f32 %v189_v47, %v170_v42 }
  0x96   :  { %v137_v40 = vpop.f32.mrf.mxu3 }
  0x97   :  { %v197_v43 = vmul.f32 %v184_v39, %v169_v37  ;;  %v138_v44 = vadd.f32 %v137_v40, %v90_v38 }
  0x99   :  { %v200_v45 = vadd.f32 %v197_v43, %v196_v41  ;;  %v167_v46 = vadd.f32 %v162_v33, %v138_v44 }
  0x9b   :  { %v171_v49 = vmax.f32 %v167_v46, 0.0  ;;  %v201_v52 = vadd.f32 %v200_v45, %v198_v48 }
  0x9d   :  { %v199_v51 = vmul.f32 %v194_v50, %v171_v49 }
  0x9f   :  { %v202_v53 = vadd.f32 %v201_v52, %v199_v51 }
  0xa1   :  { %v203_v54 = vrot.slane %v202_v53, 4 }
  0xa3   :  { %v204_v55 = vadd.f32 %v203_v54, %v202_v53 }
  0xa5   :  { %v205_v56 = vrot.slane %v204_v55, 2 }
  0xa7   :  { %v206_v57 = vadd.f32 %v205_v56, %v204_v55 }
  0xa9   :  { %v207_v59 = vrot.slane %v206_v57, 1 }
  0xab   :  { %v208_v61 = vadd.f32 %v207_v59, %v206_v57 }
  0xad   :  { %v216_v62 = vadd.f32 %v215_v60, %v208_v61 }
  0xaf   :  { %217 = vst [vmem:[%s376_s7] sm:$0x1] %v216_v62 }

</bundles_post_ra>
